<compile_context>
chip_gen: v6e
topology: v6e:2x2x1
jax: 0.10.0
libtpu: 0.0.40
codegen_flags: <defaults>
</compile_context>

<pallas_src>
import functools

import jax
import jax.numpy as jnp
from jax.experimental import pallas as pl
from jax.experimental.pallas import tpu as pltpu

LANE = 128                       # TPU lane width
IN_ROWS = 8                      # sublane-aligned rows reserved for the (W1|b1) block
SLAB_ROWS = IN_ROWS + 2 * LANE   # 8 (W1|b1) + 128 (W2|b2) + 128 (W3|b3) = 264
OUT_LANES = 8                    # narrow HBM output width (>= action_size)


def dqn_kernel(x_ref, p_ref, o_ref, *, state_size):
    # x_ref: (tb, state_size) raw states
    # p_ref: (SLAB_ROWS, 128) packed parameter slab (resident in VMEM)
    # o_ref: (tb, OUT_LANES)  narrow output; Q-values live in cols [0:action_size)
    x = x_ref[...]
    w1 = p_ref[0:state_size, :]                    # (state_size, 128): W1 in cols [0:H)
    b1 = p_ref[state_size:state_size + 1, :]       # (1, 128): b1 in cols [0:H), 1.0 at col H
    w2 = p_ref[IN_ROWS:IN_ROWS + LANE, :]          # (128, 128): W2 rows + b2 row (+ carry 1)
    w3 = p_ref[IN_ROWS + LANE:SLAB_ROWS, :]        # (128, 128): W3 rows + b3 row

    # fc1 + relu: explicit bias add; col `hidden` becomes relu(0 + 1) = 1 (the carry).
    h1 = jnp.maximum(jnp.dot(x, w1, preferred_element_type=jnp.float32) + b1, 0.0)
    # fc2 + relu: bias folded via the carried ones column.
    h2 = jnp.maximum(jnp.dot(h1, w2, preferred_element_type=jnp.float32), 0.0)
    # fc3: bias folded; store only the useful lane prefix (masked vst, no relayout).
    q = jnp.dot(h2, w3, preferred_element_type=jnp.float32)
    o_ref[...] = q[:, :OUT_LANES].astype(o_ref.dtype)


def pack_params(params, state_size, hidden, action_size):
    """Pack (w1,b1,w2,b2,w3,b3) into one (SLAB_ROWS, 128) f32 slab.

    Biases are extra K-rows; a '1' is carried through padded column `hidden`
    so fc2/fc3 need no broadcast bias-add."""
    assert state_size + 1 <= IN_ROWS
    assert hidden + 1 <= LANE and action_size <= OUT_LANES <= LANE
    w1, b1, w2, b2, w3, b3 = params
    slab = jnp.zeros((SLAB_ROWS, LANE), jnp.float32)
    # Block 1: rows [0, IN_ROWS)
    slab = slab.at[0:state_size, 0:hidden].set(w1)
    slab = slab.at[state_size, 0:hidden].set(b1.reshape(-1))
    slab = slab.at[state_size, hidden].set(1.0)          # seeds the carried ones column
    # Block 2: rows [IN_ROWS, IN_ROWS + 128)
    r2 = IN_ROWS
    slab = slab.at[r2:r2 + hidden, 0:hidden].set(w2)
    slab = slab.at[r2 + hidden, 0:hidden].set(b2.reshape(-1))
    slab = slab.at[r2 + hidden, hidden].set(1.0)          # keeps carrying the ones column
    # Block 3: rows [IN_ROWS + 128, SLAB_ROWS)
    r3 = IN_ROWS + LANE
    slab = slab.at[r3:r3 + hidden, 0:action_size].set(w3)
    slab = slab.at[r3 + hidden, 0:action_size].set(b3.reshape(-1))
    return slab


def _round_up(n, m):
    return ((n + m - 1) // m) * m


def dqn_forward(x, slab, *, state_size, action_size, tb=None):
    assert action_size <= OUT_LANES
    B = x.shape[0]
    if tb is None:
        tb = min(2048, _round_up(B, 8))      # big sublane-aligned batch tile
    tb = _round_up(tb, 8)
    B_pad = _round_up(B, tb)

    # Feed raw states; only pad the batch dimension if the tile doesn't divide B.
    xp = x.astype(jnp.float32)
    if B_pad != B:
        xp = jnp.pad(xp, ((0, B_pad - B), (0, 0)))

    out = pl.pallas_call(
        functools.partial(dqn_kernel, state_size=state_size),
        out_shape=jax.ShapeDtypeStruct((B_pad, OUT_LANES), jnp.float32),
        grid=(B_pad // tb,),
        in_specs=[
            pl.BlockSpec((tb, state_size), lambda i: (i, 0)),     # raw x tile
            pl.BlockSpec((SLAB_ROWS, LANE), lambda i: (0, 0)),    # resident param slab
        ],
        out_specs=pl.BlockSpec((tb, OUT_LANES), lambda i: (i, 0)),
        compiler_params=pltpu.CompilerParams(
            dimension_semantics=("parallel",)),
    )(xp, slab)
    return out[:B, :action_size]


def init_params(key, state_size, action_size, hidden=24):
    # Deterministic synthetic init (uniform, roughly torch Linear fan-in scaling).
    # Weights stored as (in, out); biases as (1, out).
    def linear_init(k, fan_in, fan_out):
        kw, kb = jax.random.split(k)
        bound = 1.0 / jnp.sqrt(fan_in)
        w = jax.random.uniform(kw, (fan_in, fan_out), jnp.float32, -bound, bound)
        b = jax.random.uniform(kb, (1, fan_out), jnp.float32, -bound, bound)
        return w, b

    k1, k2, k3 = jax.random.split(key, 3)
    w1, b1 = linear_init(k1, state_size, hidden)
    w2, b2 = linear_init(k2, hidden, hidden)
    w3, b3 = linear_init(k3, hidden, action_size)
    return (w1, b1, w2, b2, w3, b3)


def dqn_reference(x, params):
    w1, b1, w2, b2, w3, b3 = params
    h1 = jnp.maximum(x @ w1 + b1, 0.0)
    h2 = jnp.maximum(h1 @ w2 + b2, 0.0)
    return h2 @ w3 + b3


if __name__ == "__main__":
    state_size = 4    # CartPole-v1 observation dim
    action_size = 2   # CartPole-v1 action dim
    hidden = 24
    batch = 8

    key = jax.random.PRNGKey(0)
    kx, kp = jax.random.split(key)
    x = jax.random.normal(kx, (batch, state_size), dtype=jnp.float32)
    params = init_params(kp, state_size, action_size, hidden)
    slab = pack_params(params, state_size, hidden, action_size)

    out = dqn_forward(x, slab, state_size=state_size, action_size=action_size)
    out = jax.block_until_ready(out)

    ref = dqn_reference(x, params)
    assert out.shape == (batch, action_size)
    assert jnp.allclose(out, ref, atol=1e-4, rtol=1e-4), "mismatch vs JAX reference"

    print("KERNEL_OK")
</pallas_src>

<mosaic_0001>
module attributes {stable_mosaic.version = 11 : i64} {
  func.func @dqn_kernel(%arg0: i32, %arg1: memref<8x4xf32, #tpu.memory_space<vmem>>, %arg2: memref<264x128xf32, #tpu.memory_space<vmem>>, %arg3: memref<8x8xf32, #tpu.memory_space<vmem>>) attributes {dimension_semantics = [#tpu.dimension_semantics<parallel>], iteration_bounds = array<i64: 1>, scalar_prefetch = 0 : i64, scratch_operands = 0 : i64, tpu.core_type = #tpu.core_type<tc>, window_params = [{transform_indices = @transform_0, window_bounds = array<i64: 8, 4>}, {pipeline_mode = #tpu.pipeline_mode<synchronous>, transform_indices = @transform_1, window_bounds = array<i64: 264, 128>}, {transform_indices = @transform_2, window_bounds = array<i64: 8, 8>}]} {
    %c0 = arith.constant 0 : index
    %c0_0 = arith.constant 0 : index
    %0 = vector.load %arg1[%c0, %c0_0] : memref<8x4xf32, #tpu.memory_space<vmem>>, vector<8x4xf32>
    %c0_1 = arith.constant 0 : index
    %c0_2 = arith.constant 0 : index
    %1 = vector.load %arg2[%c0_1, %c0_2] : memref<264x128xf32, #tpu.memory_space<vmem>>, vector<4x128xf32>
    %c4 = arith.constant 4 : index
    %c0_3 = arith.constant 0 : index
    %2 = vector.load %arg2[%c4, %c0_3] : memref<264x128xf32, #tpu.memory_space<vmem>>, vector<1x128xf32>
    %c8 = arith.constant 8 : index
    %c0_4 = arith.constant 0 : index
    %3 = vector.load %arg2[%c8, %c0_4] : memref<264x128xf32, #tpu.memory_space<vmem>>, vector<128x128xf32>
    %c136 = arith.constant 136 : index
    %c0_5 = arith.constant 0 : index
    %4 = vector.load %arg2[%c136, %c0_5] : memref<264x128xf32, #tpu.memory_space<vmem>>, vector<128x128xf32>
    %cst = arith.constant dense<0.000000e+00> : vector<8x128xf32>
    %5 = tpu.matmul %0, %1, %cst {dimension_numbers = #tpu.dot_dimension_numbers<[1], [0], [0], [1], [0, 0, 1, 1], [], []>} : vector<8x4xf32>, vector<4x128xf32>, vector<8x128xf32> -> vector<8x128xf32>
    %6 = vector.broadcast %2 : vector<1x128xf32> to vector<8x128xf32>
    %7 = arith.addf %5, %6 : vector<8x128xf32>
    %cst_6 = arith.constant 0.000000e+00 : f32
    %8 = vector.broadcast %cst_6 : f32 to vector<8x128xf32>
    %9 = arith.maximumf %7, %8 : vector<8x128xf32>
    %cst_7 = arith.constant dense<0.000000e+00> : vector<8x128xf32>
    %10 = tpu.matmul %9, %3, %cst_7 {dimension_numbers = #tpu.dot_dimension_numbers<[1], [0], [0], [1], [0, 0, 1, 1], [], []>} : vector<8x128xf32>, vector<128x128xf32>, vector<8x128xf32> -> vector<8x128xf32>
    %cst_8 = arith.constant 0.000000e+00 : f32
    %11 = vector.broadcast %cst_8 : f32 to vector<8x128xf32>
    %12 = arith.maximumf %10, %11 : vector<8x128xf32>
    %cst_9 = arith.constant dense<0.000000e+00> : vector<8x128xf32>
    %13 = tpu.matmul %12, %4, %cst_9 {dimension_numbers = #tpu.dot_dimension_numbers<[1], [0], [0], [1], [0, 0, 1, 1], [], []>} : vector<8x128xf32>, vector<128x128xf32>, vector<8x128xf32> -> vector<8x128xf32>
    %14 = vector.extract_strided_slice %13 {offsets = [0, 0], sizes = [8, 8], strides = [1, 1]} : vector<8x128xf32> to vector<8x8xf32>
    %c0_10 = arith.constant 0 : index
    %c0_11 = arith.constant 0 : index
    %15 = vector.load %arg3[%c0_10, %c0_11] : memref<8x8xf32, #tpu.memory_space<vmem>>, vector<8x8xf32>
    tpu.vector_store %arg3[%c0_10, %c0_11], %14 {strides = array<i32>} : memref<8x8xf32, #tpu.memory_space<vmem>>, vector<8x8xf32>,
    return
  }
  func.func @transform_0(%arg0: i32) -> (i32, i32) {
    %c0_i32 = arith.constant 0 : i32
    %c0_i32_0 = arith.constant 0 : i32
    return %arg0, %c0_i32 : i32, i32
  }
  func.func @transform_1(%arg0: i32) -> (i32, i32) {
    %c0_i32 = arith.constant 0 : i32
    %c0_i32_0 = arith.constant 0 : i32
    %c0_i32_1 = arith.constant 0 : i32
    return %c0_i32, %c0_i32_0 : i32, i32
  }
  func.func @transform_2(%arg0: i32) -> (i32, i32) {
    %c0_i32 = arith.constant 0 : i32
    %c0_i32_0 = arith.constant 0 : i32
    return %arg0, %c0_i32 : i32, i32
  }
}

</mosaic_0001>

<bundles_post_ra>
// kernel: tpu_custom_call.1
= control target key start
LH: loop header
LB: loop body
LE: loop exit
PB: predicated region body
PF: predicated region fallthrough
CT: control target
= control target key end

     0   :  { %7 = vsyncpa [#allocation3], 0  ;;  %s535_s0 = inlined_call_operand.vmem [shape: f32[8,4], index: 0, kind: input, shape index: {}]   ;;  %s536_s1 = inlined_call_operand.hbm [shape: f32[264,128], index: 1, kind: input, shape index: {}]   ;;  %s537_s2 = inlined_call_operand.hbm [shape: f32[8,8], index: 2, kind: output, shape index: {}]  }
   0x1   :  { %8 = vsyncpa [#allocation4], 0  ;;  %s466_s9 = smov [#allocation2]  }
   0x2   :  { %s16_s10 = sshll.u32 %s466_s9, 4  ;;  %s17_s10 = int_to_ptr.vmem [resolvable:$true] %s16_s10 }
   0x3   :  { %s430_s11 = scalar_lea.vmem %s17_s10, 4224  ;;  %p435_p1 = scmp.lt.s32.totalorder %s17_s10, %s17_s10 }
   0x4   :  { %p431_p0 = scmp.ne.s32.totalorder %s17_s10, %s430_s11  ;;  %p436_p2 = scmp.lt.s32.totalorder %s430_s11, %s430_s11 }
   0x6   :  { %p437_p3 = por %p436_p2, %p435_p1 }
   0x8   :  { %p438_p4 = pnand %p437_p3, %p431_p0 }
   0xa   :  { %441 = shalt.err (!%p438_p4)
}
   0xb   :  { %s467_s12 = smov 128   ;;  %s468_s13 = smov 8  }
   0xc   :  { %22 = dma.hbm_to_vmem [thread:$0]  %s536_s1, 4224, %s17_s10, [#allocation3], %s467_s12, %s467_s12, %s468_s13  }
   0xd   :  { %462 = dma.done.wait [#allocation3], 4224  }
   0xe   :  { %463 = vsyncadd [#allocation3], 4294963072  ;;  %v469_v0 = vmov 0.0   ;;  %vm470_vm0 = vmmov 0   ;;  %vm69_vm1 = vcmask 1043456   ;;  %vm65_vm2 = vcmask 31744  }
   0xf   :  { %341 = vmatprep.subr.mxu0 %v469_v0  ;;  %343 = vmatprep.mubr.msk.f32.mxu0 %vm470_vm0, %v469_v0  ;;  %v27_v1 = vld [vmem:[#allocation2] sm:$0xf]  ;;  %v43_v4 = vld [vmem:[#allocation2 + $0x78] sm:$0xff]  ;;  %v42_v5 = vld [vmem:[#allocation2 + $0x70] sm:$0xff]  ;;  %vm285_vm3 = vcmask 64512  }
  0x10   :  { %346 = vmatprep.subr.mxu1 %v469_v0  ;;  %378 = vmatprep.mubr.msk.f32.mxu1 %vm470_vm0, %v469_v0  ;;  %v26_v2 = vld [vmem:[%s535_s0] sm:$0xff]  ;;  %v41_v6 = vld [vmem:[#allocation2 + $0x68] sm:$0xff]  ;;  %v39_v8 = vld [vmem:[#allocation2 + $0x58] sm:$0xff]  ;;  %s471_s0 = smov [#allocation5]  }
  0x11   :  { %v44_v3 = vld [vmem:[#allocation2 + $0x80] sm:$0xff]  ;;  %342 = vmatpush3.msk.msra.mxu0 %vm69_vm1, %v27_v1  ;;  %v38_v9 = vld [vmem:[#allocation2 + $0x50] sm:$0xff]  ;;  %v37_v10 = vld [vmem:[#allocation2 + $0x48] sm:$0xff]  ;;  %s293_s1 = sshll.u32 %s471_s0, 4  ;;  %s294_s1 = int_to_ptr.vmem [resolvable:$true] %s293_s1 }
  0x12   :  { %347 = vmatpush3.msra.mxu1 %v44_v3  ;;  %344 = vmatmul.mubr.msk.f32.vlgmr.msra.gmra.mxu0 %vm65_vm2, %v26_v2  ;;  %v40_v7 = vld [vmem:[#allocation2 + $0x60] sm:$0xff]  ;;  %v35_v12 = vld [vmem:[#allocation2 + $0x38] sm:$0xff]  ;;  %v34_v13 = vld [vmem:[#allocation2 + $0x30] sm:$0xff]  ;;  %s442_s18 = scalar_lea.vmem %s294_s1, 128  ;;  %p447_p6 = scmp.lt.s32.totalorder %s294_s1, %s294_s1 }
  0x13   :  { %348 = vmatprep.subr.mxu1 %v469_v0  ;;  %381 = vmatprep.subr.mxu0 %v469_v0  ;;  %v36_v11 = vld [vmem:[#allocation2 + $0x40] sm:$0xff]  ;;  %v33_v14 = vld [vmem:[#allocation2 + $0x28] sm:$0xff]  ;;  %v31_v16 = vld [vmem:[#allocation2 + $0x18] sm:$0xff]  ;;  %p443_p5 = scmp.ne.s32.totalorder %s294_s1, %s442_s18  ;;  %p448_p7 = scmp.lt.s32.totalorder %s442_s18, %s442_s18 }
  0x14   :  { %349 = vmatpush3.msra.mxu1 %v43_v4  ;;  %413 = vmatprep.mubr.msk.f32.mxu0 %vm470_vm0, %v469_v0  ;;  %v32_v15 = vld [vmem:[#allocation2 + $0x20] sm:$0xff]  ;;  %v30_v17 = vld [vmem:[#allocation2 + $0x10] sm:$0xff]  ;;  %v29_v18 = vld [vmem:[#allocation2 + $0x8] sm:$0xff] }
  0x15   :  { %350 = vmatprep.subr.mxu1 %v469_v0  ;;  %v60_v19 = vld [vmem:[#allocation2 + $0x100] sm:$0xff]  ;;  %v59_v20 = vld [vmem:[#allocation2 + $0xf8] sm:$0xff]  ;;  %v58_v21 = vld [vmem:[#allocation2 + $0xf0] sm:$0xff]  ;;  %p449_p8 = por %p448_p7, %p447_p6 }
  0x16   :  { %351 = vmatpush3.msra.mxu1 %v42_v5  ;;  %382 = vmatpush3.msra.mxu0 %v60_v19  ;;  %v57_v22 = vld [vmem:[#allocation2 + $0xe8] sm:$0xff]  ;;  %v56_v23 = vld [vmem:[#allocation2 + $0xe0] sm:$0xff]  ;;  %v55_v24 = vld [vmem:[#allocation2 + $0xd8] sm:$0xff] }
  0x17   :  { %352 = vmatprep.subr.mxu1 %v469_v0  ;;  %383 = vmatprep.subr.mxu0 %v469_v0  ;;  %v54_v25 = vld [vmem:[#allocation2 + $0xd0] sm:$0xff]  ;;  %v53_v26 = vld [vmem:[#allocation2 + $0xc8] sm:$0xff]  ;;  %v52_v27 = vld [vmem:[#allocation2 + $0xc0] sm:$0xff]  ;;  %p450_p9 = pnand %p449_p8, %p443_p5 }
  0x18   :  { %353 = vmatpush3.msra.mxu1 %v41_v6  ;;  %384 = vmatpush3.msra.mxu0 %v59_v20  ;;  %v51_v28 = vld [vmem:[#allocation2 + $0xb8] sm:$0xff]  ;;  %v50_v29 = vld [vmem:[#allocation2 + $0xb0] sm:$0xff]  ;;  %v49_v30 = vld [vmem:[#allocation2 + $0xa8] sm:$0xff] }
  0x19   :  { %354 = vmatprep.subr.mxu1 %v469_v0  ;;  %385 = vmatprep.subr.mxu0 %v469_v0  ;;  %v48_v31 = vld [vmem:[#allocation2 + $0xa0] sm:$0xff]  ;;  %v47_v32 = vld [vmem:[#allocation2 + $0x98] sm:$0xff]  ;;  %v46_v38 = vld [vmem:[#allocation2 + $0x90] sm:$0xff] }
  0x1a   :  { %355 = vmatpush3.msra.mxu1 %v40_v7  ;;  %386 = vmatpush3.msra.mxu0 %v58_v21  ;;  %v302_v33 = vld [vmem:[#allocation2 + $0x4] ss:$0 sm:$0xff]  ;;  %v45_v39 = vld [vmem:[#allocation2 + $0x88] sm:$0xff] }
  0x1b   :  { %356 = vmatprep.subr.mxu1 %v469_v0  ;;  %387 = vmatprep.subr.mxu0 %v469_v0 }
  0x1c   :  { %357 = vmatpush3.msra.mxu1 %v39_v8  ;;  %388 = vmatpush3.msra.mxu0 %v57_v22 }
  0x1d   :  { %358 = vmatprep.subr.mxu1 %v469_v0  ;;  %389 = vmatprep.subr.mxu0 %v469_v0 }
  0x1e   :  { %359 = vmatpush3.msra.mxu1 %v38_v9  ;;  %390 = vmatpush3.msra.mxu0 %v56_v23 }
  0x1f   :  { %360 = vmatprep.subr.mxu1 %v469_v0  ;;  %391 = vmatprep.subr.mxu0 %v469_v0 }
  0x20   :  { %361 = vmatpush3.msra.mxu1 %v37_v10  ;;  %392 = vmatpush3.msra.mxu0 %v55_v24 }
  0x21   :  { %362 = vmatprep.subr.mxu1 %v469_v0  ;;  %393 = vmatprep.subr.mxu0 %v469_v0 }
  0x22   :  { %363 = vmatpush3.msra.mxu1 %v36_v11  ;;  %394 = vmatpush3.msra.mxu0 %v54_v25 }
  0x23   :  { %364 = vmatprep.subr.mxu1 %v469_v0  ;;  %395 = vmatprep.subr.mxu0 %v469_v0 }
  0x24   :  { %365 = vmatpush3.msra.mxu1 %v35_v12  ;;  %396 = vmatpush3.msra.mxu0 %v53_v26 }
  0x25   :  { %366 = vmatprep.subr.mxu1 %v469_v0  ;;  %397 = vmatprep.subr.mxu0 %v469_v0 }
  0x26   :  { %367 = vmatpush3.msra.mxu1 %v34_v13  ;;  %398 = vmatpush3.msra.mxu0 %v52_v27 }
  0x27   :  { %368 = vmatprep.subr.mxu1 %v469_v0  ;;  %399 = vmatprep.subr.mxu0 %v469_v0 }
  0x28   :  { %369 = vmatpush3.msra.mxu1 %v33_v14  ;;  %400 = vmatpush3.msra.mxu0 %v51_v28 }
  0x29   :  { %370 = vmatprep.subr.mxu1 %v469_v0  ;;  %401 = vmatprep.subr.mxu0 %v469_v0 }
  0x2a   :  { %371 = vmatpush3.msra.mxu1 %v32_v15  ;;  %402 = vmatpush3.msra.mxu0 %v50_v29 }
  0x2b   :  { %372 = vmatprep.subr.mxu1 %v469_v0  ;;  %403 = vmatprep.subr.mxu0 %v469_v0 }
  0x2c   :  { %373 = vmatpush3.msra.mxu1 %v31_v16  ;;  %404 = vmatpush3.msra.mxu0 %v49_v30 }
  0x2d   :  { %374 = vmatprep.subr.mxu1 %v469_v0  ;;  %405 = vmatprep.subr.mxu0 %v469_v0 }
  0x2e   :  { %375 = vmatpush3.msra.mxu1 %v30_v17  ;;  %406 = vmatpush3.msra.mxu0 %v48_v31 }
  0x2f   :  { %376 = vmatprep.subr.mxu1 %v469_v0  ;;  %407 = vmatprep.subr.mxu0 %v469_v0 }
  0x30   :  { %377 = vmatpush3.msra.mxu1 %v29_v18  ;;  %408 = vmatpush3.msra.mxu0 %v47_v32 }
  0x31   :  { %409 = vmatprep.subr.mxu0 %v469_v0 }
  0x32   :  { %410 = vmatpush3.msra.mxu0 %v46_v38 }
  0x33   :  { %411 = vmatprep.subr.mxu0 %v469_v0 }
  0x34   :  { %412 = vmatpush3.msra.mxu0 %v45_v39 }
  0xd2   :  { %v139_v34 = vpop.f32.mrf.mxu0 }
  0xd3   :  { %v140_v35 = vadd.f32 %v302_v33, %v139_v34 }
  0xd4   :  { %v345_v36 = vpop.f32.mrf.mxu0 }
  0xd5   :  { %v143_v37 = vmax.f32 %v140_v35, 0.0 }
  0xd7   :  { %379 = vmatmul.mubr.f32.vlgmr.msra.gmra.mxu1 %v143_v37 }
 0x197   :  { %v210_v40 = vpop.f32.mrf.mxu1 }
 0x198   :  { %v214_v41 = vmax.f32 %v210_v40, 0.0 }
 0x199   :  { %v380_v42 = vpop.f32.mrf.mxu1 }
 0x19a   :  { %414 = vmatmul.mubr.f32.vlgmr.msra.gmra.mxu0 %v214_v41 }
 0x25a   :  { %v281_v43 = vpop.f32.mrf.mxu0 }
 0x25b   :  { %286 = vst.msk [vmem:[#allocation5] sm:$0xff] %vm285_vm3, %v281_v43 }
 0x25c   :  { %v415_v44 = vpop.f32.mrf.mxu0 }
 0x25d   :  { %453 = shalt.err (!%p450_p9)
}
 0x25e   :  { %296 = dma.vmem_to_hbm [thread:$0]  %s294_s1, 128, %s537_s2, [#allocation4]  }
 0x25f   :  { %464 = dma.done.wait [#allocation4], 128  }
 0x260   :  { %465 = vsyncadd [#allocation4], 4294967168 }
 0x261   :  { %300 = vsyncpa [#allocation3], 1 }
 0x262   :  { %301 = vsyncpa [#allocation4], 1 }

</bundles_post_ra>
